<compile_context>
chip_gen: v7x
topology: tpu7x:2x2x1
jax: 0.10.0
libtpu: 0.0.40
codegen_flags: <defaults>
</compile_context>

<pallas_src>
import jax
import jax.numpy as jnp
from jax.experimental import pallas as pl
from jax.experimental.pallas import tpu as pltpu


def _attention_kernel(wq_ref, enc_ref, mask_ref, wctxT_ref, vw_ref,
                      ctx_ref, attn_ref):
    Bt, S, D = enc_ref.shape

    enc = enc_ref[...]                                  # (Bt, S, D) mxu dtype
    # Fold batch into the matmul M dimension: (Bt*S, D) @ (D, D) on the MXU.
    uh = jnp.dot(enc.reshape(Bt * S, D), wctxT_ref[...],
                 preferred_element_type=jnp.float32).reshape(Bt, S, D)

    # wq precomputed in the wrapper; broadcast over the sequence (sublane) axis.
    wquh = jnp.tanh(uh + wq_ref[...])                   # (Bt, S, D) f32

    # scores via VPU multiply + lane reduce (avoids an M=1 MXU op and an
    # in-kernel transpose). mask_ref already carries v_b and -1e30 * src_mask.
    s = jnp.sum(wquh * vw_ref[...], axis=-1, keepdims=True) + mask_ref[...]

    # Numerically-stable softmax over the sequence axis (axis=1).
    m = jnp.max(s, axis=1, keepdims=True)               # (Bt, 1, 1)
    e = jnp.exp(s - m)
    denom = jnp.sum(e, axis=1, keepdims=True)
    attn = e * pl.reciprocal(denom, approx=False)       # (Bt, S, 1)

    attn_ref[...] = attn
    # ctx = sum_s attn[b, s] * enc[b, s, :]  (VPU mul + sublane reduce; f32).
    ctx_ref[...] = jnp.sum(attn * enc.astype(jnp.float32),
                           axis=1, keepdims=True)       # (Bt, 1, D)


def attention_forward(s_prev, enc_hs, src_mask, params, *,
                      block_batch=8, mxu_dtype=jnp.float32):
    """s_prev: (B,1,D) f32, enc_hs: (B,S,D) f32, src_mask: (B,S) bool.

    Returns (ctx (B, D) f32, attn_weights (B, S) f32).
    """
    B, S, D = enc_hs.shape
    w_ctx, w_q, b_q, v_w, v_b = params

    # Hoisted query projection: one small XLA matmul instead of an M=1 MXU op
    # re-issued every grid step.
    wq = s_prev.reshape(B, D).astype(jnp.float32) @ w_q.T.astype(jnp.float32)
    wq = wq + b_q                                        # (B, D)

    # Batch-tile the grid: Bt rows per step (pad B up to a multiple of Bt).
    Bt = max(1, min(block_batch, 32))
    Bpad = ((B + Bt - 1) // Bt) * Bt
    pad = Bpad - B

    wq3 = jnp.pad(wq, ((0, pad), (0, 0))).reshape(Bpad, 1, D)
    enc_p = jnp.pad(enc_hs, ((0, pad), (0, 0), (0, 0))).astype(mxu_dtype)
    # Additive finite mask with the scalar v bias folded in (it cancels in the
    # softmax anyway): no compare/select in-kernel, no -inf NaN hazard.
    mask_add = jnp.where(src_mask, jnp.float32(-1e30), jnp.float32(0.0)) + v_b[0]
    mask3 = jnp.pad(mask_add, ((0, pad), (0, 0))).reshape(Bpad, S, 1)

    wctx_t = w_ctx.T.astype(mxu_dtype)     # pre-transposed: kernel does A @ B
    vw3 = v_w.reshape(1, 1, D).astype(jnp.float32)

    grid = (Bpad // Bt,)
    batch_map = lambda b: (b, 0, 0)
    const2 = lambda b: (0, 0)
    const3 = lambda b: (0, 0, 0)

    ctx3, attn3 = pl.pallas_call(
        _attention_kernel,
        out_shape=(
            jax.ShapeDtypeStruct((Bpad, 1, D), jnp.float32),
            jax.ShapeDtypeStruct((Bpad, S, 1), jnp.float32),
        ),
        grid_spec=pltpu.PrefetchScalarGridSpec(
            num_scalar_prefetch=0,
            grid=grid,
            in_specs=[
                pl.BlockSpec((Bt, 1, D), batch_map),    # wq (precomputed)
                pl.BlockSpec((Bt, S, D), batch_map),    # enc_hs
                pl.BlockSpec((Bt, S, 1), batch_map),    # additive mask (+v_b)
                pl.BlockSpec((D, D), const2),           # W_ctx^T (resident)
                pl.BlockSpec((1, 1, D), const3),        # v_w     (resident)
            ],
            out_specs=[
                pl.BlockSpec((Bt, 1, D), batch_map),    # ctx
                pl.BlockSpec((Bt, S, 1), batch_map),    # attention weights
            ],
        ),
        compiler_params=pltpu.CompilerParams(
            # Parallel batch axis -> shards grid steps across both TCs on v7x.
            dimension_semantics=("parallel",),
            # Explicit scoped-VMEM budget, safe on v5e/v6e (128 MiB) and v7x
            # (64 MiB). Shrink block_batch if Bt*S*D tiles outgrow this.
            vmem_limit_bytes=32 * 1024 * 1024,
        ),
    )(wq3, enc_p, mask3, wctx_t, vw3)

    return ctx3[:B].reshape(B, D), attn3[:B].reshape(B, S)


def _reference(s_prev, enc_hs, src_mask, params):
    w_ctx, w_q, b_q, v_w, v_b = params
    uh = jnp.einsum("bsd,ed->bse", enc_hs, w_ctx)
    wq = jnp.einsum("btd,ed->bte", s_prev, w_q) + b_q
    wquh = jnp.tanh(wq + uh)
    scores = jnp.einsum("bsd,od->bso", wquh, v_w)[..., 0] + v_b[0]
    scores = jnp.where(src_mask, -jnp.inf, scores)
    attn = jax.nn.softmax(scores, axis=-1)
    ctx = jnp.einsum("bs,bsd->bd", attn, enc_hs)
    return ctx, attn


if __name__ == "__main__":
    B, S, D = 2, 8, 32
    key = jax.random.PRNGKey(0)
    k1, k2, k3, k4, k5, k6, k7 = jax.random.split(key, 7)

    # Deterministic "nn.Linear"-shaped parameters.
    w_ctx = jax.random.normal(k1, (D, D), jnp.float32) * 0.1   # linear_ctx.weight
    w_q = jax.random.normal(k2, (D, D), jnp.float32) * 0.1     # linear_query.weight
    b_q = jax.random.normal(k3, (D,), jnp.float32) * 0.1       # linear_query.bias
    v_w = jax.random.normal(k4, (1, D), jnp.float32) * 0.1     # v.weight
    v_b = jax.random.normal(k5, (1,), jnp.float32) * 0.1       # v.bias
    params = (w_ctx, w_q, b_q, v_w, v_b)

    s_prev = jax.random.normal(k6, (B, 1, D), jnp.float32)
    enc_hs = jax.random.normal(k7, (B, S, D), jnp.float32)
    # Mask out the last two source positions of batch element 1.
    src_mask = jnp.zeros((B, S), jnp.bool_).at[1, S - 2:].set(True)

    ctx_expect, attn_expect = _reference(s_prev, enc_hs, src_mask, params)

    # f32 MXU-operand path (tight check).
    ctx, attn = attention_forward(s_prev, enc_hs, src_mask, params)
    jax.block_until_ready((ctx, attn))
    assert jnp.allclose(ctx, ctx_expect, atol=1e-4, rtol=1e-4)
    assert jnp.allclose(attn, attn_expect, atol=1e-4, rtol=1e-4)

    # bf16 MXU-operand path (v6e/v7x-oriented; f32 accumulation/tanh/softmax).
    ctx_bf, attn_bf = attention_forward(s_prev, enc_hs, src_mask, params,
                                        mxu_dtype=jnp.bfloat16)
    jax.block_until_ready((ctx_bf, attn_bf))
    assert jnp.allclose(ctx_bf, ctx_expect, atol=5e-2, rtol=5e-2)
    assert jnp.allclose(attn_bf, attn_expect, atol=5e-2, rtol=5e-2)

    print("KERNEL_OK")
</pallas_src>

<mosaic_0001>
module attributes {stable_mosaic.version = 11 : i64} {
  func.func @_attention_kernel(%arg0: i32, %arg1: memref<8x1x32xf32, #tpu.memory_space<vmem>>, %arg2: memref<8x8x32xf32, #tpu.memory_space<vmem>>, %arg3: memref<8x8x1xf32, #tpu.memory_space<vmem>>, %arg4: memref<32x32xf32, #tpu.memory_space<vmem>>, %arg5: memref<1x1x32xf32, #tpu.memory_space<vmem>>, %arg6: memref<8x1x32xf32, #tpu.memory_space<vmem>>, %arg7: memref<8x8x1xf32, #tpu.memory_space<vmem>>) attributes {dimension_semantics = [#tpu.dimension_semantics<parallel>], iteration_bounds = array<i64: 1>, scalar_prefetch = 0 : i64, scratch_operands = 0 : i64, tpu.core_type = #tpu.core_type<tc>, window_params = [{transform_indices = @transform_0, window_bounds = array<i64: 8, 1, 32>}, {transform_indices = @transform_1, window_bounds = array<i64: 8, 8, 32>}, {transform_indices = @transform_2, window_bounds = array<i64: 8, 8, 1>}, {pipeline_mode = #tpu.pipeline_mode<synchronous>, transform_indices = @transform_3, window_bounds = array<i64: 32, 32>}, {pipeline_mode = #tpu.pipeline_mode<synchronous>, transform_indices = @transform_4, window_bounds = array<i64: 1, 1, 32>}, {transform_indices = @transform_5, window_bounds = array<i64: 8, 1, 32>}, {transform_indices = @transform_6, window_bounds = array<i64: 8, 8, 1>}]} {
    %c0 = arith.constant 0 : index
    %c0_0 = arith.constant 0 : index
    %c0_1 = arith.constant 0 : index
    %0 = vector.load %arg2[%c0, %c0_0, %c0_1] : memref<8x8x32xf32, #tpu.memory_space<vmem>>, vector<8x8x32xf32>
    %1 = vector.shape_cast %0 : vector<8x8x32xf32> to vector<64x32xf32>
    %c0_2 = arith.constant 0 : index
    %c0_3 = arith.constant 0 : index
    %2 = vector.load %arg4[%c0_2, %c0_3] : memref<32x32xf32, #tpu.memory_space<vmem>>, vector<32x32xf32>
    %cst = arith.constant dense<0.000000e+00> : vector<64x32xf32>
    %3 = tpu.matmul %1, %2, %cst {dimension_numbers = #tpu.dot_dimension_numbers<[1], [0], [0], [1], [0, 0, 1, 1], [], []>} : vector<64x32xf32>, vector<32x32xf32>, vector<64x32xf32> -> vector<64x32xf32>
    %4 = vector.shape_cast %3 : vector<64x32xf32> to vector<8x8x32xf32>
    %c0_4 = arith.constant 0 : index
    %c0_5 = arith.constant 0 : index
    %c0_6 = arith.constant 0 : index
    %5 = vector.load %arg1[%c0_4, %c0_5, %c0_6] : memref<8x1x32xf32, #tpu.memory_space<vmem>>, vector<8x1x32xf32>
    %6 = vector.broadcast %5 : vector<8x1x32xf32> to vector<8x8x32xf32>
    %7 = arith.addf %4, %6 : vector<8x8x32xf32>
    %8 = math.tanh %7 : vector<8x8x32xf32>
    %c0_7 = arith.constant 0 : index
    %c0_8 = arith.constant 0 : index
    %c0_9 = arith.constant 0 : index
    %9 = vector.load %arg5[%c0_7, %c0_8, %c0_9] : memref<1x1x32xf32, #tpu.memory_space<vmem>>, vector<1x1x32xf32>
    %10 = vector.broadcast %9 : vector<1x1x32xf32> to vector<8x8x32xf32>
    %11 = arith.mulf %8, %10 : vector<8x8x32xf32>
    %cst_10 = arith.constant dense<0.000000e+00> : vector<8x8xf32>
    %12 = vector.multi_reduction <add>, %11, %cst_10 [2] : vector<8x8x32xf32> to vector<8x8xf32>
    %13 = vector.shape_cast %12 : vector<8x8xf32> to vector<8x8x1xf32>
    %c0_11 = arith.constant 0 : index
    %c0_12 = arith.constant 0 : index
    %c0_13 = arith.constant 0 : index
    %14 = vector.load %arg3[%c0_11, %c0_12, %c0_13] : memref<8x8x1xf32, #tpu.memory_space<vmem>>, vector<8x8x1xf32>
    %15 = arith.addf %13, %14 : vector<8x8x1xf32>
    %cst_14 = arith.constant dense<0xFF800000> : vector<8x1xf32>
    %16 = vector.multi_reduction <maximumf>, %15, %cst_14 [1] : vector<8x8x1xf32> to vector<8x1xf32>
    %17 = vector.shape_cast %16 : vector<8x1xf32> to vector<8x1x1xf32>
    %18 = vector.broadcast %17 : vector<8x1x1xf32> to vector<8x8x1xf32>
    %19 = arith.subf %15, %18 : vector<8x8x1xf32>
    %20 = math.exp %19 : vector<8x8x1xf32>
    %cst_15 = arith.constant dense<0.000000e+00> : vector<8x1xf32>
    %21 = vector.multi_reduction <add>, %20, %cst_15 [1] : vector<8x8x1xf32> to vector<8x1xf32>
    %22 = vector.shape_cast %21 : vector<8x1xf32> to vector<8x1x1xf32>
    %23 = tpu.reciprocal %22 : vector<8x1x1xf32> -> vector<8x1x1xf32>
    %24 = vector.broadcast %23 : vector<8x1x1xf32> to vector<8x8x1xf32>
    %25 = arith.mulf %20, %24 : vector<8x8x1xf32>
    %c0_16 = arith.constant 0 : index
    %c0_17 = arith.constant 0 : index
    %c0_18 = arith.constant 0 : index
    %26 = vector.load %arg7[%c0_16, %c0_17, %c0_18] : memref<8x8x1xf32, #tpu.memory_space<vmem>>, vector<8x8x1xf32>
    tpu.vector_store %arg7[%c0_16, %c0_17, %c0_18], %25 {strides = array<i32>} : memref<8x8x1xf32, #tpu.memory_space<vmem>>, vector<8x8x1xf32>,
    %27 = vector.broadcast %25 : vector<8x8x1xf32> to vector<8x8x32xf32>
    %28 = arith.mulf %27, %0 : vector<8x8x32xf32>
    %cst_19 = arith.constant dense<0.000000e+00> : vector<8x32xf32>
    %29 = vector.multi_reduction <add>, %28, %cst_19 [1] : vector<8x8x32xf32> to vector<8x32xf32>
    %30 = vector.shape_cast %29 : vector<8x32xf32> to vector<8x1x32xf32>
    %c0_20 = arith.constant 0 : index
    %c0_21 = arith.constant 0 : index
    %c0_22 = arith.constant 0 : index
    %31 = vector.load %arg6[%c0_20, %c0_21, %c0_22] : memref<8x1x32xf32, #tpu.memory_space<vmem>>, vector<8x1x32xf32>
    tpu.vector_store %arg6[%c0_20, %c0_21, %c0_22], %30 {strides = array<i32>} : memref<8x1x32xf32, #tpu.memory_space<vmem>>, vector<8x1x32xf32>,
    return
  }
  func.func @transform_0(%arg0: i32) -> (i32, i32, i32) {
    %c0_i32 = arith.constant 0 : i32
    %c0_i32_0 = arith.constant 0 : i32
    %c0_i32_1 = arith.constant 0 : i32
    return %arg0, %c0_i32, %c0_i32_0 : i32, i32, i32
  }
  func.func @transform_1(%arg0: i32) -> (i32, i32, i32) {
    %c0_i32 = arith.constant 0 : i32
    %c0_i32_0 = arith.constant 0 : i32
    %c0_i32_1 = arith.constant 0 : i32
    return %arg0, %c0_i32, %c0_i32_0 : i32, i32, i32
  }
  func.func @transform_2(%arg0: i32) -> (i32, i32, i32) {
    %c0_i32 = arith.constant 0 : i32
    %c0_i32_0 = arith.constant 0 : i32
    %c0_i32_1 = arith.constant 0 : i32
    return %arg0, %c0_i32, %c0_i32_0 : i32, i32, i32
  }
  func.func @transform_3(%arg0: i32) -> (i32, i32) {
    %c0_i32 = arith.constant 0 : i32
    %c0_i32_0 = arith.constant 0 : i32
    %c0_i32_1 = arith.constant 0 : i32
    return %c0_i32, %c0_i32_0 : i32, i32
  }
  func.func @transform_4(%arg0: i32) -> (i32, i32, i32) {
    %c0_i32 = arith.constant 0 : i32
    %c0_i32_0 = arith.constant 0 : i32
    %c0_i32_1 = arith.constant 0 : i32
    %c0_i32_2 = arith.constant 0 : i32
    return %c0_i32, %c0_i32_0, %c0_i32_1 : i32, i32, i32
  }
  func.func @transform_5(%arg0: i32) -> (i32, i32, i32) {
    %c0_i32 = arith.constant 0 : i32
    %c0_i32_0 = arith.constant 0 : i32
    %c0_i32_1 = arith.constant 0 : i32
    return %arg0, %c0_i32, %c0_i32_0 : i32, i32, i32
  }
  func.func @transform_6(%arg0: i32) -> (i32, i32, i32) {
    %c0_i32 = arith.constant 0 : i32
    %c0_i32_0 = arith.constant 0 : i32
    %c0_i32_1 = arith.constant 0 : i32
    return %arg0, %c0_i32, %c0_i32_0 : i32, i32, i32
  }
}

</mosaic_0001>

<bundles_post_ra>
// kernel: tpu_custom_call.1
= control target key start
LH: loop header
LB: loop body
LE: loop exit
PB: predicated region body
PF: predicated region fallthrough
CT: control target
= control target key end

     0   :  { %12 = vsyncpa [#allocation3], 0  ;;  %s1060_s0 = inlined_call_operand.vmem [shape: f32[8,1,32], index: 0, kind: input, shape index: {}]   ;;  %s1061_s1 = inlined_call_operand.vmem [shape: f32[8,8,32], index: 1, kind: input, shape index: {}]   ;;  %s1062_s2 = inlined_call_operand.vmem [shape: f32[8,8,1], index: 2, kind: input, shape index: {}]   ;;  %s1063_s3 = inlined_call_operand.hbm [shape: f32[32,32], index: 3, kind: input, shape index: {}]   ;;  %s1064_s4 = inlined_call_operand.vmem [shape: f32[1,1,32], index: 4, kind: input, shape index: {}]   ;;  %s1065_s5 = inlined_call_operand.hbm [shape: f32[8,1,32], index: 5, kind: output, shape index: {0}]   ;;  %s1066_s6 = inlined_call_operand.vmem [shape: f32[8,8,1], index: 6, kind: output, shape index: {1}]  }
   0x1   :  { %13 = vsyncpa [#allocation4], 0  ;;  %s767_s21 = smov [#allocation2]   ;;  %s719_s25 = scalar_lea.hbm %s1063_s3, 512 }
   0x2   :  { %s25_s22 = sshll.u32 %s767_s21, 4  ;;  %p720_p0 = scmp.ne.s32.totalorder %s1063_s3, %s719_s25  ;;  %s26_s22 = int_to_ptr.vmem [resolvable:$true] %s25_s22 }
   0x3   :  { %p723_p1 = scmp.lt.u32.totalorder %s719_s25, %s1063_s3 }
   0x5   :  { %p725_p2 = pnand %p723_p1, %p720_p0 }
   0x7   :  { %728 = shalt.err (!%p725_p2)
}
   0x8   :  { %s729_s30 = scalar_lea.vmem %s26_s22, 512  ;;  %p734_p4 = scmp.lt.s32.totalorder %s26_s22, %s26_s22 }
   0x9   :  { %p730_p3 = scmp.ne.s32.totalorder %s26_s22, %s729_s30  ;;  %p735_p5 = scmp.lt.s32.totalorder %s729_s30, %s729_s30 }
   0xb   :  { %p736_p6 = por %p735_p5, %p734_p4 }
   0xd   :  { %p737_p7 = pnand %p736_p6, %p730_p3 }
   0xf   :  { %740 = shalt.err (!%p737_p7)
}
  0x10   :  { %s768_s7 = smov 128   ;;  %s769_s8 = smov 8  }
  0x11   :  { %31 = dma.hbm_to_vmem [thread:$0]  %s1063_s3, 512, %s26_s22, [#allocation3], %s768_s7, %s768_s7, %s769_s8  }
  0x12   :  { %763 = dma.done.wait [#allocation3], 512  }
  0x13   :  { %764 = vsyncadd [#allocation3], 4294966784  ;;  %vm49_vm0 = vcmask 261120   ;;  %v45_v0 = vld [vmem:[#allocation2] sm:$0xff]  ;;  %v46_v1 = vld [vmem:[#allocation2 + $0x8] sm:$0xff]  ;;  %v770_v63 = vmov 0  }
  0x14   :  { %v47_v2 = vld [vmem:[#allocation2 + $0x10] sm:$0xff]  ;;  %v650_v3 = vpack.c.bf16 %v46_v1, %v45_v0  ;;  %v48_v4 = vld [vmem:[#allocation2 + $0x18] sm:$0xff]  ;;  %v824_v5 = vld [vmem:[%s1061_s1] sm:$0xff]  ;;  %670 = vset.pattern.permute.xlu1 %v770_v63  ;;  %669 = vset.pattern.permute.xlu0 %v770_v63  ;;  %vm306_vm1 = vcmask 7168   ;;  %vm571_vm2 = vcmask 253952  }
  0x15   :  { %v829_v6 = vld [vmem:[%s1061_s1 + $0x20] sm:$0xff]  ;;  %v654_v7 = vpack.c.bf16 %v48_v4, %v47_v2  ;;  %638 = vmatprep.mubr.msk.f32.mxu0 %vm49_vm0, %v824_v5  ;;  %v838_v8 = vld [vmem:[%s1061_s1 + $0x8] sm:$0xff]  ;;  %v848_v10 = vld [vmem:[%s1061_s1 + $0x10] sm:$0xff] }
  0x16   :  { %644 = vmatprep.mubr.msk.f32.mxu1 %vm49_vm0, %v829_v6  ;;  %651 = vmatprep.subr.bf16.mxu0 %v650_v3  ;;  %v843_v9 = vld [vmem:[%s1061_s1 + $0x28] sm:$0xff]  ;;  %v853_v11 = vld [vmem:[%s1061_s1 + $0x30] sm:$0xff]  ;;  %v864_v12 = vld [vmem:[%s1061_s1 + $0x18] sm:$0xff] }
  0x17   :  { %658 = vmatprep.subr.bf16.mxu1 %v650_v3  ;;  %653 = vmatpush3.bf16.msra.mxu0 %v650_v3  ;;  %v871_v13 = vld [vmem:[%s1061_s1 + $0x38] sm:$0xff]  ;;  %v610_v14 = vld [vmem:[%s1060_s0 + $0x1] ss:$0 sm:$0xff]  ;;  %v614_v15 = vld [vmem:[%s1060_s0 + $0x5] ss:$0 sm:$0xff] }
  0x18   :  { %660 = vmatpush3.bf16.msra.mxu1 %v650_v3  ;;  %655 = vmatprep.subr.bf16.mxu0 %v654_v7  ;;  %v609_v16 = vld [vmem:[%s1060_s0] ss:$0 sm:$0xff]  ;;  %v613_v17 = vld [vmem:[%s1060_s0 + $0x4] ss:$0 sm:$0xff]  ;;  %v612_v25 = vld [vmem:[%s1060_s0 + $0x3] ss:$0 sm:$0xff] }
  0x19   :  { %659 = vmatprep.subr.bf16.mxu1 %v654_v7  ;;  %v616_v27 = vld [vmem:[%s1060_s0 + $0x7] ss:$0 sm:$0xff]  ;;  %v611_v28 = vld [vmem:[%s1060_s0 + $0x2] ss:$0 sm:$0xff]  ;;  %v615_v29 = vld [vmem:[%s1060_s0 + $0x6] ss:$0 sm:$0xff] }
  0x1a   :  { %v617_v38 = vld [vmem:[%s1064_s4] ss:$0 sm:$0xff]  ;;  %v291_v0 = vld [vmem:[%s1062_s2 + $0x8] sm:$0xff] }
  0x1b   :  { %657 = vmatpush3.bf16.msra.mxu0 %v654_v7  ;;  %v295_v1 = vld [vmem:[%s1062_s2 + $0x28] sm:$0xff] }
  0x1c   :  { %661 = vmatpush3.bf16.msra.mxu1 %v654_v7 }
  0x1e   :  { %639 = vmatmul.mubr.msk.f32.vlgmr.msra.gmra.mrb[0].mxu0 %vm49_vm0, %v838_v8 }
  0x1f   :  { %645 = vmatmul.mubr.msk.f32.vlgmr.msra.gmra.mrb[0].mxu1 %vm49_vm0, %v843_v9  ;;  %641 = vmatprep.mubr.msk.f32.mxu0 %vm49_vm0, %v848_v10 }
  0x20   :  { %647 = vmatprep.mubr.msk.f32.mxu1 %vm49_vm0, %v853_v11 }
  0x22   :  { %642 = vmatmul.mubr.msk.f32.gmra.mrb[2].mxu0 %vm49_vm0, %v864_v12 }
  0x23   :  { %648 = vmatmul.mubr.msk.f32.gmra.mrb[2].mxu1 %vm49_vm0, %v871_v13 }
  0xf1   :  { %v640_v18 = vpop.f32.mrb[0].mxu0 }
  0xf2   :  { %v646_v19 = vpop.f32.mrb[0].mxu1  ;;  %v236_v20 = vadd.f32 %v640_v18, %v610_v14  ;;  %v140_v22 = vpop.f32.mrb[1].mxu0  ;;  %v290_v14 = vld [vmem:[%s1062_s2] sm:$0xff] }
  0xf3   :  { %v240_v21 = vadd.f32 %v646_v19, %v614_v15  ;;  %v160_v23 = vpop.f32.mrb[1].mxu1  ;;  %v235_v24 = vadd.f32 %v609_v16, %v140_v22  ;;  %v293_v16 = vld [vmem:[%s1062_s2 + $0x18] sm:$0xff] }
  0xf4   :  { %v239_v26 = vadd.f32 %v613_v17, %v160_v23  ;;  %671 = vtanh.f32 %v236_v20 }
  0xf5   :  { %673 = vtanh.f32 %v240_v21  ;;  %v643_v30 = vpop.f32.mrb[2].mxu0 }
  0xf6   :  { %v649_v31 = vpop.f32.mrb[2].mxu1  ;;  %675 = vtanh.f32 %v235_v24  ;;  %v238_v32 = vadd.f32 %v643_v30, %v612_v25  ;;  %v150_v33 = vpop.f32.mrb[3].mxu0  ;;  %v294_v25 = vld [vmem:[%s1062_s2 + $0x20] sm:$0xff] }
  0xf7   :  { %v242_v34 = vadd.f32 %v649_v31, %v616_v27  ;;  %v170_v35 = vpop.f32.mrb[3].mxu1  ;;  %677 = vtanh.f32 %v239_v26  ;;  %v237_v36 = vadd.f32 %v611_v28, %v150_v33  ;;  %v292_v28 = vld [vmem:[%s1062_s2 + $0x10] sm:$0xff] }
  0xf8   :  { %v241_v37 = vadd.f32 %v615_v29, %v170_v35  ;;  %679 = vtanh.f32 %v238_v32 }
  0xf9   :  { %681 = vtanh.f32 %v237_v36 }
  0xfa   :  { %683 = vtanh.f32 %v242_v34 }
  0xfb   :  { %685 = vtanh.f32 %v241_v37 }
  0xfe   :  { %v672_v39 = vpop.eup %671 }
  0xff   :  { %v674_v40 = vpop.eup %673  ;;  %v259_v41 = vmul.f32 %v672_v39, %v617_v38 }
 0x100   :  { %v676_v42 = vpop.eup %675  ;;  %v263_v43 = vmul.f32 %v674_v40, %v617_v38  ;;  %v296_v40 = vld [vmem:[%s1062_s2 + $0x30] sm:$0xff] }
 0x101   :  { %v678_v44 = vpop.eup %677  ;;  %v269_v45 = vsel %vm49_vm0, %v259_v41, 0.0  ;;  %v258_v46 = vmul.f32 %v676_v42, %v617_v38 }
 0x102   :  { %v680_v47 = vpop.eup %679  ;;  %v281_v48 = vsel %vm49_vm0, %v263_v43, 0.0  ;;  %270 = vadd.xlane.f32.xlu0 %v269_v45  ;;  %v262_v56 = vmul.f32 %v678_v44, %v617_v38  ;;  %v297_v44 = vld [vmem:[%s1062_s2 + $0x38] sm:$0xff] }
 0x103   :  { %v682_v49 = vpop.eup %681  ;;  %282 = vadd.xlane.f32.xlu1 %v281_v48  ;;  %v261_v50 = vmul.f32 %v680_v47, %v617_v38  ;;  %v266_v54 = vsel %vm49_vm0, %v258_v46, 0.0 }
 0x104   :  { %v684_v51 = vpop.eup %683  ;;  %v260_v52 = vmul.f32 %v682_v49, %v617_v38  ;;  %v278_v60 = vsel %vm49_vm0, %v262_v56, 0.0 }
 0x105   :  { %v686_v53 = vpop.eup %685  ;;  %v275_v55 = vsel %vm49_vm0, %v261_v50, 0.0  ;;  %v265_v59 = vmul.f32 %v684_v51, %v617_v38 }
 0x106   :  { %267 = vadd.xlane.f32.xlu0 %v266_v54  ;;  %v264_v57 = vmul.f32 %v686_v53, %v617_v38  ;;  %v272_v58 = vsel %vm49_vm0, %v260_v52, 0.0 }
 0x107   :  { %276 = vadd.xlane.f32.xlu1 %v275_v55  ;;  %v287_v62 = vsel %vm49_vm0, %v265_v59, 0.0 }
 0x108   :  { %v284_v61 = vsel %vm49_vm0, %v264_v57, 0.0 }
 0x10a   :  { %279 = vadd.xlane.f32.xlu0 %v278_v60 }
 0x10b   :  { %273 = vadd.xlane.f32.xlu1 %v272_v58 }
 0x10e   :  { %285 = vadd.xlane.f32.xlu0 %v284_v61 }
 0x10f   :  { %288 = vadd.xlane.f32.xlu1 %v287_v62 }
 0x18f   :  { %v271_v2 = vpop.xlane.xlu0 %270 }
 0x190   :  { %v283_v3 = vpop.xlane.xlu1 %282  ;;  %v299_v4 = vadd.f32 %v291_v0, %v271_v2 }
 0x191   :  { %v303_v7 = vadd.f32 %v295_v1, %v283_v3 }
 0x192   :  { %v314_v15 = vsel %vm306_vm1, %v299_v4, -inf }
 0x193   :  { %v342_v17 = vsel %vm306_vm1, %v303_v7, -inf  ;;  %v315_v18 = vrot.slane %v314_v15, 4  ;;  %v268_v19 = vpop.xlane.xlu0 %267 }
 0x194   :  { %v343_v20 = vrot.slane %v342_v17, 4  ;;  %v926_v21 = vadd.f32 %v290_v14, %v268_v19  ;;  %v277_v22 = vpop.xlane.xlu1 %276 }
 0x195   :  { %v316_v23 = vmax.f32 %v314_v15, %v315_v18  ;;  %v928_v24 = vadd.f32 %v293_v16, %v277_v22 }
 0x196   :  { %v344_v26 = vmax.f32 %v342_v17, %v343_v20  ;;  %v307_v27 = vsel %vm306_vm1, %v926_v21, -inf }
 0x197   :  { %v317_v29 = vrot.slane %v316_v23, 2  ;;  %v308_v30 = vrot.slane %v307_v27, 4  ;;  %v328_v31 = vsel %vm306_vm1, %v928_v24, -inf  ;;  %v280_v32 = vpop.xlane.xlu0 %279 }
 0x198   :  { %v345_v33 = vrot.slane %v344_v26, 2  ;;  %v329_v34 = vrot.slane %v328_v31, 4  ;;  %v940_v35 = vadd.f32 %v294_v25, %v280_v32  ;;  %v274_v36 = vpop.xlane.xlu1 %273 }
 0x199   :  { %v318_v37 = vmax.f32 %v316_v23, %v317_v29  ;;  %v309_v38 = vmax.f32 %v307_v27, %v308_v30  ;;  %v300_v39 = vadd.f32 %v292_v28, %v274_v36 }
 0x19a   :  { %v346_v41 = vmax.f32 %v344_v26, %v345_v33  ;;  %v330_v42 = vmax.f32 %v328_v31, %v329_v34  ;;  %v335_v43 = vsel %vm306_vm1, %v940_v35, -inf }
 0x19b   :  { %v319_v45 = vrot.slane %v318_v37, 1  ;;  %v310_v46 = vrot.slane %v309_v38, 2  ;;  %v336_v47 = vrot.slane %v335_v43, 4  ;;  %v321_v48 = vsel %vm306_vm1, %v300_v39, -inf  ;;  %v286_v49 = vpop.xlane.xlu0 %285 }
 0x19c   :  { %v347_v50 = vrot.slane %v346_v41, 1  ;;  %v331_v51 = vrot.slane %v330_v42, 2  ;;  %v322_v52 = vrot.slane %v321_v48, 4  ;;  %v304_v53 = vadd.f32 %v296_v40, %v286_v49  ;;  %v289_v54 = vpop.xlane.xlu1 %288 }
 0x19d   :  { %v320_v55 = vmax.f32 %v318_v37, %v319_v45  ;;  %v311_v56 = vmax.f32 %v309_v38, %v310_v46  ;;  %v337_v57 = vmax.f32 %v335_v43, %v336_v47  ;;  %v305_v58 = vadd.f32 %v297_v44, %v289_v54 }
 0x19e   :  { %v348_v59 = vmax.f32 %v346_v41, %v347_v50  ;;  %v332_v60 = vmax.f32 %v330_v42, %v331_v51  ;;  %v323_v61 = vmax.f32 %v321_v48, %v322_v52  ;;  %v349_v62 = vsel %vm306_vm1, %v304_v53, -inf }
 0x19f   :  { %v364_v63 = vsub.f32 %v299_v4, %v320_v55  ;;  %v312_v0 = vrot.slane %v311_v56, 1  ;;  %v338_v1 = vrot.slane %v337_v57, 2  ;;  %v350_v2 = vrot.slane %v349_v62, 4 }
 0x1a0   :  { %v368_v3 = vsub.f32 %v303_v7, %v348_v59  ;;  %v333_v14 = vrot.slane %v332_v60, 1  ;;  %v324_v15 = vrot.slane %v323_v61, 2  ;;  %v356_v16 = vsel %vm306_vm1, %v305_v58, -inf }
 0x1a1   :  { %v373_v17 = vmul.f32 1.442695, %v364_v63  ;;  %v313_v18 = vmax.f32 %v311_v56, %v312_v0  ;;  %v339_v19 = vmax.f32 %v337_v57, %v338_v1  ;;  %v351_v20 = vmax.f32 %v349_v62, %v350_v2 }
 0x1a2   :  { %v381_v22 = vmul.f32 1.442695, %v368_v3  ;;  %v334_v23 = vmax.f32 %v332_v60, %v333_v14  ;;  %v325_v25 = vmax.f32 %v323_v61, %v324_v15  ;;  %v357_v26 = vrot.slane %v356_v16, 4 }
 0x1a3   :  { %687 = vpow2.f32 %v373_v17  ;;  %v363_v27 = vsub.f32 %v926_v21, %v313_v18  ;;  %v340_v4 = vrot.slane %v339_v19, 1  ;;  %v352_v28 = vrot.slane %v351_v20, 2 }
 0x1a4   :  { %689 = vpow2.f32 %v381_v22  ;;  %v366_v7 = vsub.f32 %v928_v24, %v334_v23  ;;  %v326_v29 = vrot.slane %v325_v25, 1  ;;  %v358_v30 = vmax.f32 %v356_v16, %v357_v26 }
 0x1a5   :  { %v371_v31 = vmul.f32 1.442695, %v363_v27  ;;  %v341_v32 = vmax.f32 %v339_v19, %v340_v4  ;;  %v353_v33 = vmax.f32 %v351_v20, %v352_v28 }
 0x1a6   :  { %v377_v34 = vmul.f32 1.442695, %v366_v7  ;;  %v327_v36 = vmax.f32 %v325_v25, %v326_v29  ;;  %v359_v37 = vrot.slane %v358_v30, 2 }
 0x1a7   :  { %691 = vpow2.f32 %v371_v31  ;;  %v367_v38 = vsub.f32 %v940_v35, %v341_v32  ;;  %v354_v40 = vrot.slane %v353_v33, 1 }
 0x1a8   :  { %693 = vpow2.f32 %v377_v34  ;;  %v365_v41 = vsub.f32 %v300_v39, %v327_v36  ;;  %v360_v21 = vmax.f32 %v358_v30, %v359_v37 }
 0x1a9   :  { %v379_v42 = vmul.f32 1.442695, %v367_v38  ;;  %v355_v43 = vmax.f32 %v353_v33, %v354_v40 }
 0x1aa   :  { %v375_v44 = vmul.f32 1.442695, %v365_v41  ;;  %v361_v45 = vrot.slane %v360_v21, 1 }
 0x1ab   :  { %695 = vpow2.f32 %v379_v42  ;;  %v369_v24 = vsub.f32 %v304_v53, %v355_v43 }
 0x1ac   :  { %697 = vpow2.f32 %v375_v44  ;;  %v362_v46 = vmax.f32 %v360_v21, %v361_v45 }
 0x1ad   :  { %v956_v47 = vpop.eup %687  ;;  %v383_v48 = vmul.f32 1.442695, %v369_v24 }
 0x1ae   :  { %v958_v49 = vpop.eup %689  ;;  %v394_v35 = vsel %vm306_vm1, %v956_v47, 0.0  ;;  %v370_v50 = vsub.f32 %v305_v58, %v362_v46 }
 0x1af   :  { %v422_v39 = vsel %vm306_vm1, %v958_v49, 0.0  ;;  %v395_v51 = vrot.slane %v394_v35, 4  ;;  %699 = vpow2.f32 %v383_v48 }
 0x1b0   :  { %v423_v52 = vrot.slane %v422_v39, 4  ;;  %v385_v54 = vmul.f32 1.442695, %v370_v50 }
 0x1b1   :  { %v964_v55 = vpop.eup %691  ;;  %v396_v53 = vadd.f32 %v395_v51, %v394_v35 }
 0x1b2   :  { %v966_v56 = vpop.eup %693  ;;  %v424_v57 = vadd.f32 %v423_v52, %v422_v39  ;;  %v387_v59 = vsel %vm306_vm1, %v964_v55, 0.0  ;;  %701 = vpow2.f32 %v385_v54 }
 0x1b3   :  { %v397_v60 = vrot.slane %v396_v53, 2  ;;  %v388_v61 = vrot.slane %v387_v59, 4  ;;  %v408_v58 = vsel %vm306_vm1, %v966_v56, 0.0 }
 0x1b4   :  { %v425_v62 = vrot.slane %v424_v57, 2  ;;  %v409_v63 = vrot.slane %v408_v58, 4 }
 0x1b5   :  { %v972_v0 = vpop.eup %695  ;;  %v389_v1 = vadd.f32 %v388_v61, %v387_v59  ;;  %v398_v2 = vadd.f32 %v397_v60, %v396_v53 }
 0x1b6   :  { %v974_v3 = vpop.eup %697  ;;  %v410_v14 = vadd.f32 %v409_v63, %v408_v58  ;;  %v415_v15 = vsel %vm306_vm1, %v972_v0, 0.0  ;;  %v426_v16 = vadd.f32 %v425_v62, %v424_v57 }
 0x1b7   :  { %v390_v17 = vrot.slane %v389_v1, 2  ;;  %v416_v18 = vrot.slane %v415_v15, 4  ;;  %v401_v19 = vsel %vm306_vm1, %v974_v3, 0.0  ;;  %v399_v20 = vrot.slane %v398_v2, 1 }
 0x1b8   :  { %v411_v22 = vrot.slane %v410_v14, 2  ;;  %v402_v23 = vrot.slane %v401_v19, 4  ;;  %v427_v25 = vrot.slane %v426_v16, 1 }
 0x1b9   :  { %v980_v26 = vpop.eup %699  ;;  %v417_v27 = vadd.f32 %v416_v18, %v415_v15  ;;  %v400_v4 = vadd.f32 %v399_v20, %v398_v2  ;;  %v391_v28 = vadd.f32 %v390_v17, %v389_v1 }
 0x1ba   :  { %v403_v7 = vadd.f32 %v402_v23, %v401_v19  ;;  %v429_v29 = vsel %vm306_vm1, %v980_v26, 0.0  ;;  %v428_v30 = vadd.f32 %v427_v25, %v426_v16  ;;  %v412_v31 = vadd.f32 %v411_v22, %v410_v14 }
 0x1bb   :  { %v418_v32 = vrot.slane %v417_v27, 2  ;;  %v430_v33 = vrot.slane %v429_v29, 4  ;;  %703 = vrcp.f32 %v400_v4  ;;  %v392_v34 = vrot.slane %v391_v28, 1 }
 0x1bc   :  { %v702_v36 = vpop.eup %701  ;;  %v404_v37 = vrot.slane %v403_v7, 2  ;;  %705 = vrcp.f32 %v428_v30  ;;  %v413_v38 = vrot.slane %v412_v31, 1 }
 0x1bd   :  { %v431_v40 = vadd.f32 %v430_v33, %v429_v29  ;;  %v436_v41 = vsel %vm306_vm1, %v702_v36, 0.0  ;;  %v393_v21 = vadd.f32 %v392_v34, %v391_v28  ;;  %v419_v42 = vadd.f32 %v418_v32, %v417_v27 }
 0x1be   :  { %v437_v43 = vrot.slane %v436_v41, 4  ;;  %v414_v44 = vadd.f32 %v413_v38, %v412_v31  ;;  %v405_v45 = vadd.f32 %v404_v37, %v403_v7 }
 0x1bf   :  { %v432_v24 = vrot.slane %v431_v40, 2  ;;  %707 = vrcp.f32 %v393_v21  ;;  %v420_v46 = vrot.slane %v419_v42, 1 }
 0x1c0   :  { %v438_v48 = vadd.f32 %v437_v43, %v436_v41  ;;  %709 = vrcp.f32 %v414_v44  ;;  %v406_v35 = vrot.slane %v405_v45, 1 }
 0x1c1   :  { %v421_v50 = vadd.f32 %v420_v46, %v419_v42  ;;  %v433_v39 = vadd.f32 %v432_v24, %v431_v40 }
 0x1c2   :  { %v439_v51 = vrot.slane %v438_v48, 2  ;;  %v407_v52 = vadd.f32 %v406_v35, %v405_v45 }
 0x1c3   :  { %711 = vrcp.f32 %v421_v50  ;;  %v434_v54 = vrot.slane %v433_v39, 1 }
 0x1c4   :  { %713 = vrcp.f32 %v407_v52  ;;  %v440_v53 = vadd.f32 %v439_v51, %v438_v48 }
 0x1c5   :  { %v704_v57 = vpop.eup %703  ;;  %v435_v59 = vadd.f32 %v434_v54, %v433_v39 }
 0x1c6   :  { %v706_v60 = vpop.eup %705  ;;  %v452_v61 = vmul.f32 %v704_v57, %v956_v47  ;;  %v441_v58 = vrot.slane %v440_v53, 1 }
 0x1c7   :  { %v456_v62 = vmul.f32 %v706_v60, %v958_v49  ;;  %715 = vrcp.f32 %v435_v59 }
 0x1c8   :  { %460 = vst.msk [vmem:[%s1066_s6 + $0x8] sm:$0xff] %vm306_vm1, %v452_v61  ;;  %474 = vperm.xlu1 %670, %v452_v61   ;;  %v442_v63 = vadd.f32 %v441_v58, %v440_v53 }
 0x1c9   :  { %v708_v1 = vpop.eup %707  ;;  %464 = vst.msk [vmem:[%s1066_s6 + $0x28] sm:$0xff] %vm306_vm1, %v456_v62 }
 0x1ca   :  { %v710_v2 = vpop.eup %709  ;;  %v451_v47 = vmul.f32 %v708_v1, %v964_v55  ;;  %717 = vrcp.f32 %v442_v63 }
 0x1cb   :  { %v454_v49 = vmul.f32 %v710_v2, %v966_v56 }
 0x1cc   :  { %469 = vperm.xlu0 %669, %v451_v47   ;;  %459 = vst.msk [vmem:[%s1066_s6] sm:$0xff] %vm306_vm1, %v451_v47  ;;  %494 = vperm.xlu1 %670, %v456_v62  }
 0x1cd   :  { %v712_v14 = vpop.eup %711  ;;  %462 = vst.msk [vmem:[%s1066_s6 + $0x18] sm:$0xff] %vm306_vm1, %v454_v49 }
 0x1ce   :  { %v714_v15 = vpop.eup %713  ;;  %v455_v16 = vmul.f32 %v712_v14, %v972_v0 }
 0x1cf   :  { %v453_v55 = vmul.f32 %v714_v15, %v974_v3 }
 0x1d0   :  { %463 = vst.msk [vmem:[%s1066_s6 + $0x20] sm:$0xff] %vm306_vm1, %v455_v16  ;;  %489 = vperm.xlu1 %670, %v455_v16  }
 0x1d1   :  { %v716_v56 = vpop.eup %715  ;;  %461 = vst.msk [vmem:[%s1066_s6 + $0x10] sm:$0xff] %vm306_vm1, %v453_v55 }
 0x1d2   :  { %v457_v17 = vmul.f32 %v716_v56, %v980_v26 }
 0x1d4   :  { %v718_v18 = vpop.eup %717  ;;  %484 = vperm.xlu1 %670, %v454_v49   ;;  %465 = vst.msk [vmem:[%s1066_s6 + $0x30] sm:$0xff] %vm306_vm1, %v457_v17 }
 0x1d5   :  { %v458_v0 = vmul.f32 %v718_v18, %v702_v36 }
 0x1d7   :  { %466 = vst.msk [vmem:[%s1066_s6 + $0x38] sm:$0xff] %vm306_vm1, %v458_v0  ;;  %s771_s6 = smov [#allocation5]  }
 0x1d8   :  { %479 = vperm.xlu1 %670, %v453_v55   ;;  %s585_s19 = sshll.u32 %s771_s6, 4  ;;  %s586_s19 = int_to_ptr.vmem [resolvable:$true] %s585_s19 }
 0x1d9   :  { %s741_s20 = scalar_lea.vmem %s586_s19, 128  ;;  %p746_p9 = scmp.lt.s32.totalorder %s586_s19, %s586_s19 }
 0x1da   :  { %p742_p8 = scmp.ne.s32.totalorder %s586_s19, %s741_s20  ;;  %p747_p10 = scmp.lt.s32.totalorder %s741_s20, %s741_s20 }
 0x1dc   :  { %499 = vperm.xlu1 %670, %v457_v17   ;;  %p748_p11 = por %p747_p10, %p746_p9 }
 0x1de   :  { %p749_p12 = pnand %p748_p11, %p742_p8 }
 0x1e0   :  { %504 = vperm.xlu1 %670, %v458_v0  }
 0x247   :  { %v475_v3 = vpop.permute.xlu1 %474 }
 0x248   :  { %v508_v19 = vmul.f32 %v475_v3, %v838_v8 }
 0x24a   :  { %v522_v20 = vsel %vm49_vm0, %v508_v19, 0.0 }
 0x24b   :  { %v523_v22 = vrot.slane %v522_v20, 4  ;;  %v470_v23 = vpop.permute.xlu0 %469  ;;  %v495_v25 = vpop.permute.xlu1 %494 }
 0x24c   :  { %v507_v26 = vmul.f32 %v470_v23, %v824_v5  ;;  %v512_v27 = vmul.f32 %v495_v25, %v843_v9 }
 0x24d   :  { %v524_v4 = vadd.f32 %v523_v22, %v522_v20 }
 0x24e   :  { %v515_v28 = vsel %vm49_vm0, %v507_v26, 0.0  ;;  %v550_v7 = vsel %vm49_vm0, %v512_v27, 0.0 }
 0x24f   :  { %v525_v29 = vrot.slane %v524_v4, 2  ;;  %v516_v30 = vrot.slane %v515_v28, 4  ;;  %v551_v31 = vrot.slane %v550_v7, 4  ;;  %v490_v32 = vpop.permute.xlu1 %489 }
 0x250   :  { %v511_v8 = vmul.f32 %v490_v32, %v829_v6 }
 0x251   :  { %v526_v33 = vadd.f32 %v525_v29, %v524_v4  ;;  %v517_v34 = vadd.f32 %v516_v30, %v515_v28  ;;  %v552_v36 = vadd.f32 %v551_v31, %v550_v7 }
 0x252   :  { %v543_v37 = vsel %vm49_vm0, %v511_v8, 0.0 }
 0x253   :  { %v527_v38 = vrot.slane %v526_v33, 1  ;;  %v518_v5 = vrot.slane %v517_v34, 2  ;;  %v553_v40 = vrot.slane %v552_v36, 2  ;;  %v544_v9 = vrot.slane %v543_v37, 4  ;;  %v485_v41 = vpop.permute.xlu1 %484 }
 0x254   :  { %v510_v21 = vmul.f32 %v485_v41, %v864_v12 }
 0x255   :  { %v528_v42 = vadd.f32 %v527_v38, %v526_v33  ;;  %v519_v43 = vadd.f32 %v518_v5, %v517_v34  ;;  %v554_v44 = vadd.f32 %v553_v40, %v552_v36  ;;  %v545_v45 = vadd.f32 %v544_v9, %v543_v37 }
 0x256   :  { %v536_v24 = vsel %vm49_vm0, %v510_v21, 0.0 }
 0x257   :  { %573 = vst.msk [vmem:[#allocation5 + $0x1] sm:$0x1] %vm571_vm2, %v528_v42  ;;  %v520_v6 = vrot.slane %v519_v43, 1  ;;  %v555_v46 = vrot.slane %v554_v44, 1  ;;  %v546_v48 = vrot.slane %v545_v45, 2  ;;  %v537_v35 = vrot.slane %v536_v24, 4  ;;  %v480_v50 = vpop.permute.xlu1 %479 }
 0x258   :  { %v509_v39 = vmul.f32 %v480_v50, %v848_v10 }
 0x259   :  { %v521_v51 = vadd.f32 %v520_v6, %v519_v43  ;;  %v556_v52 = vadd.f32 %v555_v46, %v554_v44  ;;  %v547_v54 = vadd.f32 %v546_v48, %v545_v45  ;;  %v538_v53 = vadd.f32 %v537_v35, %v536_v24 }
 0x25a   :  { %v529_v12 = vsel %vm49_vm0, %v509_v39, 0.0 }
 0x25b   :  { %572 = vst.msk [vmem:[#allocation5] sm:$0x1] %vm571_vm2, %v521_v51  ;;  %577 = vst.msk [vmem:[#allocation5 + $0x5] sm:$0x1] %vm571_vm2, %v556_v52  ;;  %v548_v57 = vrot.slane %v547_v54, 1  ;;  %v539_v59 = vrot.slane %v538_v53, 2  ;;  %v500_v61 = vpop.permute.xlu1 %499 }
 0x25c   :  { %v530_v60 = vrot.slane %v529_v12, 4  ;;  %v513_v58 = vmul.f32 %v500_v61, %v853_v11 }
 0x25d   :  { %v549_v62 = vadd.f32 %v548_v57, %v547_v54  ;;  %v540_v63 = vadd.f32 %v539_v59, %v538_v53 }
 0x25e   :  { %v531_v1 = vadd.f32 %v530_v60, %v529_v12  ;;  %v557_v10 = vsel %vm49_vm0, %v513_v58, 0.0 }
 0x25f   :  { %576 = vst.msk [vmem:[#allocation5 + $0x4] sm:$0x1] %vm571_vm2, %v549_v62  ;;  %v541_v2 = vrot.slane %v540_v63, 1  ;;  %v558_v49 = vrot.slane %v557_v10, 4  ;;  %v505_v14 = vpop.permute.xlu1 %504 }
 0x260   :  { %v532_v47 = vrot.slane %v531_v1, 2  ;;  %v514_v15 = vmul.f32 %v505_v14, %v871_v13 }
 0x261   :  { %v542_v16 = vadd.f32 %v541_v2, %v540_v63  ;;  %v559_v56 = vadd.f32 %v558_v49, %v557_v10 }
 0x262   :  { %v533_v55 = vadd.f32 %v532_v47, %v531_v1  ;;  %v564_v17 = vsel %vm49_vm0, %v514_v15, 0.0 }
 0x263   :  { %575 = vst.msk [vmem:[#allocation5 + $0x3] sm:$0x1] %vm571_vm2, %v542_v16  ;;  %v560_v18 = vrot.slane %v559_v56, 2  ;;  %v565_v0 = vrot.slane %v564_v17, 4 }
 0x264   :  { %v534_v11 = vrot.slane %v533_v55, 1 }
 0x265   :  { %v561_v19 = vadd.f32 %v560_v18, %v559_v56  ;;  %v566_v20 = vadd.f32 %v565_v0, %v564_v17 }
 0x266   :  { %v535_v3 = vadd.f32 %v534_v11, %v533_v55 }
 0x267   :  { %v562_v22 = vrot.slane %v561_v19, 1  ;;  %v567_v23 = vrot.slane %v566_v20, 2 }
 0x268   :  { %574 = vst.msk [vmem:[#allocation5 + $0x2] sm:$0x1] %vm571_vm2, %v535_v3 }
 0x269   :  { %v563_v25 = vadd.f32 %v562_v22, %v561_v19  ;;  %v568_v26 = vadd.f32 %v567_v23, %v566_v20 }
 0x26b   :  { %578 = vst.msk [vmem:[#allocation5 + $0x6] sm:$0x1] %vm571_vm2, %v563_v25  ;;  %v569_v13 = vrot.slane %v568_v26, 1 }
 0x26d   :  { %v570_v27 = vadd.f32 %v569_v13, %v568_v26 }
 0x26f   :  { %579 = vst.msk [vmem:[#allocation5 + $0x7] sm:$0x1] %vm571_vm2, %v570_v27 }
 0x270   :  { %752 = shalt.err (!%p749_p12)
}
 0x271   :  { %s753_s23 = scalar_lea.hbm %s1065_s5, 128 }
 0x272   :  { %p754_p13 = scmp.ne.s32.totalorder %s1065_s5, %s753_s23  ;;  %p757_p0 = scmp.lt.u32.totalorder %s753_s23, %s1065_s5 }
 0x274   :  { %p759_p1 = pnand %p757_p0, %p754_p13 }
 0x276   :  { %762 = shalt.err (!%p759_p1)
}
 0x277   :  { %s772_s28 = smov 16   ;;  %s773_s29 = smov 1  }
 0x278   :  { %591 = dma.vmem_to_hbm [thread:$0]  %s586_s19, 128, %s1065_s5, [#allocation4], %s772_s28, %s772_s28, %s773_s29  }
 0x279   :  { %765 = dma.done.wait [#allocation4], 128  }
 0x27a   :  { %766 = vsyncadd [#allocation4], 4294967168 }
 0x27b   :  { %599 = vsyncpa [#allocation3], 1 }
 0x27c   :  { %600 = vsyncpa [#allocation4], 1 }

</bundles_post_ra>
